<compile_context>
chip_gen: v7x
topology: tpu7x:2x2x1
jax: 0.10.0
libtpu: 0.0.40
codegen_flags: <defaults>
</compile_context>

<pallas_src>
import jax
import jax.numpy as jnp
from jax import lax
from jax.experimental import pallas as pl
from jax.experimental.pallas import tpu as pltpu


# Total budget for the double-buffered streamed x tile (2 buffers combined).
_X_TILE_VMEM_BUDGET_BYTES = 16 * 1024 * 1024
_VMEM_LIMIT_BYTES = 32 * 1024 * 1024  # within physical VMEM on v5e/v6e/v7x


def _xtx_fold_kernel(xf_ref, acc_ref):
    """acc += xf_tile^T @ xf_tile, accumulated in the VMEM-resident output block."""
    k = pl.program_id(1)

    @pl.when(k == 0)
    def _init():
        acc_ref[...] = jnp.zeros_like(acc_ref)

    xf = xf_ref[...]
    # Contract over the (folded) row dim directly: (TM, W) x (TM, W) -> (W, W).
    acc_ref[...] += lax.dot_general(
        xf, xf,
        dimension_numbers=(((0,), (0,)), ((), ())),
        preferred_element_type=jnp.float32,
    )


def _xla_forward(x, random_matrix, eps):
    """Plain-XLA path for small/medium batches where a Pallas launch is overhead."""
    m, _ = x.shape
    p = random_matrix.shape[1]
    y = jnp.dot(x, random_matrix, preferred_element_type=jnp.float32)
    gram = jnp.dot(y.T, y, preferred_element_type=jnp.float32)
    scalar = jnp.float32(p) / (jnp.float32(m) * jnp.float32(eps))
    a = jnp.eye(p, dtype=jnp.float32) + scalar * gram
    return -0.5 * jnp.linalg.slogdet(a)[1]


def _round_up(v, mult):
    return ((v + mult - 1) // mult) * mult


def _default_num_partials():
    """2 partials (one per TensorCore) only on v7x; 1 on single-TC chips."""
    try:
        kind = jax.devices()[0].device_kind.lower()
    except Exception:
        return 1
    return 2 if "v7" in kind else 1


def tcr_with_projection_forward(x, random_matrix, eps, *, tm=16384,
                                num_partials=None, use_pallas=None):
    """Returns -0.5 * logdet(I + (p/(m*eps)) * (xR)^T (xR))  (a scalar).

    `tm` is the m-tile size measured in *folded* rows (rows of the lane-folded
    (m/fold, fold*d) view of x).
    """
    m, d = x.shape
    dp, p = random_matrix.shape
    assert dp == d
    scalar = jnp.float32(p) / (jnp.float32(m) * jnp.float32(eps))  # ORIGINAL m

    if use_pallas is None:
        # At d=32/p=16 the whole op is tiny until m reaches tens of thousands
        # of rows; below that a fused XLA dot beats any pallas_call launch.
        use_pallas = m >= 32768
    if not use_pallas:
        return _xla_forward(x, random_matrix, eps)

    if num_partials is None:
        num_partials = _default_num_partials()

    # ---- lane folding: make the streamed tile 128-lane dense -----------------
    if d < 128 and 128 % d == 0:
        fold = 128 // d
    else:
        fold = 1
    width = fold * d

    # ---- pick the (folded) m tile, with lane-padding-aware VMEM budget -------
    lane_padded_width = _round_up(width, 128)   # real VMEM row footprint
    bytes_per_frow = lane_padded_width * x.dtype.itemsize
    max_tm = max(8, (_X_TILE_VMEM_BUDGET_BYTES // (2 * bytes_per_frow)) // 8 * 8)

    m_fold = pl.cdiv(m, fold)
    tm_eff = min(tm, max(8, _round_up(pl.cdiv(m_fold, num_partials), 8)))
    tm_eff = min(tm_eff, max_tm)

    tiles_per_partial = pl.cdiv(pl.cdiv(m_fold, tm_eff), num_partials)
    m_fold_pad = num_partials * tiles_per_partial * tm_eff
    m_pad = m_fold_pad * fold
    if m_pad != m:
        # Zero rows contribute nothing to X^T X.
        x = jnp.pad(x, ((0, m_pad - m), (0, 0)))
    xf = x.reshape(m_fold_pad, width)

    cost = pl.CostEstimate(
        flops=2 * m_fold_pad * width * width,
        transcendentals=0,
        bytes_accessed=(m_fold_pad * width * x.dtype.itemsize
                        + num_partials * width * width * 4),
    )

    partial_xtx = pl.pallas_call(
        _xtx_fold_kernel,
        out_shape=jax.ShapeDtypeStruct((num_partials, width, width), jnp.float32),
        grid_spec=pltpu.PrefetchScalarGridSpec(
            num_scalar_prefetch=0,
            grid=(num_partials, tiles_per_partial),
            in_specs=[
                pl.BlockSpec((tm_eff, width),
                             lambda c, k: (c * tiles_per_partial + k, 0)),
            ],
            # Block index is constant across k -> output stays VMEM-resident
            # for the whole reduction (it IS the accumulator).
            out_specs=pl.BlockSpec((None, width, width), lambda c, k: (c, 0, 0)),
        ),
        compiler_params=pltpu.CompilerParams(
            dimension_semantics=("parallel", "arbitrary"),
            vmem_limit_bytes=_VMEM_LIMIT_BYTES),
        cost_estimate=cost,
    )(xf)

    # ---- JAX epilogue: un-fold, project with R, add I, logdet ----------------
    fold_gram = jnp.sum(partial_xtx, axis=0)            # (width, width)
    if fold > 1:
        fg4 = fold_gram.reshape(fold, d, fold, d)
        xtx = fg4[0, :, 0, :]
        for a_idx in range(1, fold):
            xtx = xtx + fg4[a_idx, :, a_idx, :]          # sum of diagonal blocks
    else:
        xtx = fold_gram                                   # (d, d) == X^T X

    r32 = random_matrix.astype(jnp.float32)
    gram = r32.T @ xtx @ r32                              # == (xR)^T (xR), exact
    a = jnp.eye(p, dtype=jnp.float32) + scalar * gram
    # TODO(synk): logdet (Cholesky/LU) has no clean Pallas TPU equivalent; the
    # tiny p x p factorization is done with jnp.linalg.slogdet.
    _, logdet = jnp.linalg.slogdet(a)
    return -0.5 * logdet


def _reference_forward(x, random_matrix, eps):
    """Pure-JAX reference mirroring the PyTorch module exactly."""
    y = x @ random_matrix                    # (m, p)
    W = y.T                                  # (p, m)
    p, m = W.shape
    I = jnp.eye(p, dtype=jnp.float32)
    scalar = p / (m * eps)
    logdet = jnp.linalg.slogdet(I + scalar * (W @ W.T))[1]
    return -(logdet / 2.0)


if __name__ == "__main__":
    # cfg: input_dim=32, gtcr_projection_dim=16, gtcr_eps=0.2, batch m=2048
    # (m and tm chosen so the tiled kernel runs a real multi-step reduction).
    m, input_dim, proj_dim = 2048, 32, 16
    eps = 0.2

    key = jax.random.PRNGKey(0)
    kx, kr = jax.random.split(key)
    x = jax.random.normal(kx, (m, input_dim), dtype=jnp.float32)
    # Deterministic init of the module's random projection matrix:
    # N(0, 1/sqrt(proj_dim)) scale, matching np.random.normal(... scale=1/sqrt(p)).
    random_matrix = (
        jax.random.normal(kr, (input_dim, proj_dim), dtype=jnp.float32)
        / jnp.sqrt(jnp.float32(proj_dim))
    )

    # Force the Pallas path (the auto heuristic would route m=2048 to XLA) and
    # use a small folded-row tile so the reduction grid has several steps.
    out = tcr_with_projection_forward(x, random_matrix, eps,
                                      tm=128, use_pallas=True)
    out = jax.block_until_ready(out)

    ref = jax.block_until_ready(_reference_forward(x, random_matrix, eps))
    assert jnp.isfinite(out), "kernel produced non-finite output"
    assert jnp.allclose(out, ref, rtol=2e-3, atol=1e-2), (out, ref)

    print("KERNEL_OK")
</pallas_src>

<mosaic_0001>
module attributes {stable_mosaic.version = 11 : i64} {
  func.func @_xtx_fold_kernel(%arg0: i32, %arg1: i32, %arg2: memref<128x128xf32, #tpu.memory_space<vmem>>, %arg3: memref<1x128x128xf32, #tpu.memory_space<vmem>>) attributes {dimension_semantics = [#tpu.dimension_semantics<parallel>, #tpu.dimension_semantics<arbitrary>], iteration_bounds = array<i64: 1, 4>, scalar_prefetch = 0 : i64, scratch_operands = 0 : i64, tpu.core_type = #tpu.core_type<tc>, window_params = [{transform_indices = @transform_0, window_bounds = array<i64: 128, 128>}, {transform_indices = @transform_1, window_bounds = array<i64: 1, 128, 128>}]} {
    %c0_i32 = arith.constant 0 : i32
    %0 = arith.cmpi eq, %arg1, %c0_i32 : i32
    %1 = arith.extui %0 : i1 to i32
    %c0_i32_0 = arith.constant 0 : i32
    %2 = arith.cmpi ne, %1, %c0_i32_0 : i32
    scf.if %2 {
      %cst_8 = arith.constant 0.000000e+00 : f32
      %11 = vector.broadcast %cst_8 : f32 to vector<128x128xf32>
      %c0_9 = arith.constant 0 : index
      %c0_10 = arith.constant 0 : index
      %c0_11 = arith.constant 0 : index
      %12 = vector.load %arg3[%c0_9, %c0_10, %c0_11] : memref<1x128x128xf32, #tpu.memory_space<vmem>>, vector<1x128x128xf32>
      %13 = vector.shape_cast %12 : vector<1x128x128xf32> to vector<128x128xf32>
      %14 = vector.shape_cast %11 : vector<128x128xf32> to vector<1x128x128xf32>
      tpu.vector_store %arg3[%c0_9, %c0_10, %c0_11], %14 {strides = array<i32>} : memref<1x128x128xf32, #tpu.memory_space<vmem>>, vector<1x128x128xf32>,
    } else {
    }
    %c0 = arith.constant 0 : index
    %c0_1 = arith.constant 0 : index
    %3 = vector.load %arg2[%c0, %c0_1] : memref<128x128xf32, #tpu.memory_space<vmem>>, vector<128x128xf32>
    %c0_2 = arith.constant 0 : index
    %c0_3 = arith.constant 0 : index
    %c0_4 = arith.constant 0 : index
    %4 = vector.load %arg3[%c0_2, %c0_3, %c0_4] : memref<1x128x128xf32, #tpu.memory_space<vmem>>, vector<1x128x128xf32>
    %5 = vector.shape_cast %4 : vector<1x128x128xf32> to vector<128x128xf32>
    %cst = arith.constant dense<0.000000e+00> : vector<128x128xf32>
    %6 = tpu.matmul %3, %3, %cst {dimension_numbers = #tpu.dot_dimension_numbers<[0], [0], [1], [1], [0, 1, 1, 1], [], []>} : vector<128x128xf32>, vector<128x128xf32>, vector<128x128xf32> -> vector<128x128xf32>
    %7 = arith.addf %5, %6 : vector<128x128xf32>
    %c0_5 = arith.constant 0 : index
    %c0_6 = arith.constant 0 : index
    %c0_7 = arith.constant 0 : index
    %8 = vector.load %arg3[%c0_5, %c0_6, %c0_7] : memref<1x128x128xf32, #tpu.memory_space<vmem>>, vector<1x128x128xf32>
    %9 = vector.shape_cast %8 : vector<1x128x128xf32> to vector<128x128xf32>
    %10 = vector.shape_cast %7 : vector<128x128xf32> to vector<1x128x128xf32>
    tpu.vector_store %arg3[%c0_5, %c0_6, %c0_7], %10 {strides = array<i32>} : memref<1x128x128xf32, #tpu.memory_space<vmem>>, vector<1x128x128xf32>,
    return
  }
  func.func @transform_0(%arg0: i32, %arg1: i32) -> (i32, i32) {
    %c4_i32 = arith.constant 4 : i32
    %0 = arith.muli %arg0, %c4_i32 : i32
    %1 = arith.addi %0, %arg1 : i32
    %c0_i32 = arith.constant 0 : i32
    %c0_i32_0 = arith.constant 0 : i32
    return %1, %c0_i32 : i32, i32
  }
  func.func @transform_1(%arg0: i32, %arg1: i32) -> (i32, i32, i32) {
    %c0_i32 = arith.constant 0 : i32
    %c0_i32_0 = arith.constant 0 : i32
    %c0_i32_1 = arith.constant 0 : i32
    return %arg0, %c0_i32, %c0_i32_0 : i32, i32, i32
  }
}

</mosaic_0001>

<bundles_post_ra>
// kernel: tpu_custom_call.1
= control target key start
LH: loop header
LB: loop body
LE: loop exit
PB: predicated region body
PF: predicated region fallthrough
CT: control target
= control target key end

     0   :  { %6 = vsyncpa [#allocation3], 0  ;;  %s999_s0 = inlined_call_operand.hbm [shape: f32[512,128], index: 0, kind: input, shape index: {}]   ;;  %s1000_s1 = inlined_call_operand.hbm [shape: f32[1,128,128], index: 1, kind: output, shape index: {}]  }
   0x1   :  { %8 = vsyncpa [#allocation3 + $0x1], 0 }
   0x2   :  { %9 = vsyncpa [#allocation4], 0  ;;  %s831_s6 = smov 0   ;;  %s833_s7 = smov 0  }
   0x3   :  { %s835_s8 = smov 0   ;;  %s837_s9 = smov 0  }
   0x4   :  { %s839_s10 = smov 0   ;;  %s841_s11 = smov 0  }
   0x5 LB: > { %s485_s12 = sadd.s32 4294967295, %s812_s11   ;;  %s24_s13 = sadd.s32 1, %s808_s10  ;;  %s812_s11 = sphi %s841_s11, %s15_s11   ;;  %s808_s10 = sphi %s839_s10, %s1009_s10   ;;  %s804_s9 = sphi %s837_s9, %s1008_s9   ;;  %s800_s8 = sphi %s835_s8, %s1007_s8   ;;  %s796_s7 = sphi %s833_s7, %s1006_s7   ;;  %s792_s6 = sphi %s831_s6, %s1005_s6  }
   0x6   : > { %p25_p0 = scmp.ge.s32.totalorder %s24_s13, 4  ;;  %s38_s14 = sadd.s32 1, %s800_s8 }
   0x7   : > { %p45_p1 = scmp.ne.s32.totalorder %s800_s8, %s796_s7  ;;  %p46_p2 = scmp.eq.s32.totalorder %s812_s11, 0 }
   0x8   : > { %s1011_s13 = smov (%p25_p0, %s24_s13), 0  ;;  %p51_p4 = scmp.ne.s32.totalorder %s796_s7, %s792_s6 }
   0x9   : > { %p867_p3 = por %p46_p2, %p45_p1  ;;  %s35_s16 = ssub.s32 %s808_s10, %s1011_s13 }
   0xa   : > { %p52_p5 = scmp.eq.s32.totalorder %s485_s12, 0  ;;  %p36_p6 = scmp.eq.s32.totalorder %s35_s16, 0 }
   0xb   : > { %p645_p8 = scmp.lt.s32.totalorder %s812_s11, 4  ;;  %s101_s19 = sand.u32 1, %s800_s8  }
   0xc   : > { %p876_p7 = por %p52_p5, %p51_p4  ;;  %s498_s20 = sshll.u32 %s808_s10, 11 }
   0xd   : > { %s882_s18 = scalar_select %p36_p6, %s800_s8, %s38_s14  }
   0xe   : > { %s488_s21 = sshll.u32 %s101_s19, 7  ;;  %s889_s24 = scalar_lea.hbm %s999_s0, %s498_s20 }
   0xf   : > { %s105_s25 = scalar_lea.vmem [#allocation2], %s488_s21  ;;  %p893_p9 = pnand %p645_p8, %p867_p3 }
  0x10   : > { %s114_s26 = sshll.u32 %s105_s25, 4  ;;  %s899_s28 = scalar_lea.sflag [#allocation3], %s101_s19  ;;  %s897_s26 = int_to_ptr.vmem [resolvable:$true] %s114_s26 }
  0x11   : > { %s702_s29 = scalar_lea.hbm %s889_s24, 2048  ;;  %p704_p11 = pneg %p893_p9 }
  0x12   : > { %p703_p10 = scmp.ne.s32.totalorder %s889_s24, %s702_s29  ;;  %s707_s3 = scalar_lea.hbm %s999_s0, 8192 }
  0x13   : > { %p708_p0 = scmp.lt.u32.totalorder %s889_s24, %s999_s0  ;;  %p709_p1 = scmp.lt.u32.totalorder %s707_s3, %s702_s29 }
  0x14   : > { %p705_p12 = pnand %p704_p11, %p703_p10  ;;  %p711_p3 = scmp.lt.u32.totalorder %s702_s29, %s889_s24 }
  0x15   : > { %p710_p2 = por %p709_p1, %p708_p0 }
  0x16   : > { %p706_p13 = pneg %p705_p12 }
  0x17   : > { %p712_p4 = por %p711_p3, %p710_p2 }
  0x19   : > { %p713_p5 = pnand %p712_p4, %p706_p13 }
  0x1b   : > { %716 = shalt.err (!%p713_p5)
}
  0x1c   : > { %s717_s6 = scalar_lea.vmem %s897_s26, 2048  ;;  %s814_s14 = smov [#allocation2]  }
  0x1d   : > { %p718_p6 = scmp.ne.s32.totalorder %s897_s26, %s717_s6  ;;  %s722_s15 = sshll.u32 %s814_s14, 4  ;;  %s723_s15 = int_to_ptr.vmem [resolvable:$false] %s722_s15 }
  0x1e   : > { %s724_s16 = scalar_lea.vmem %s723_s15, 4096  ;;  %p725_p12 = scmp.lt.s32.totalorder %s897_s26, %s723_s15 }
  0x1f   : > { %p720_p8 = pnand %p718_p6, %p704_p11  ;;  %p726_p0 = scmp.lt.s32.totalorder %s724_s16, %s717_s6 }
  0x21   : > { %p721_p10 = pneg %p720_p8  ;;  %p727_p1 = por %p726_p0, %p725_p12 }
  0x23   : > { %p728_p2 = pnand %p727_p1, %p721_p10 }
  0x25   : > { %731 = shalt.err (!%p728_p2)
}
  0x26   : > { %s815_s19 = smov 128   ;;  %s816_s20 = smov 8  }
  0x27   : > { %644 = dma.hbm_to_vmem [thread:$0]  (!%p893_p9), %s889_s24, 2048, %s897_s26, %s899_s28, %s815_s19, %s815_s19, %s816_s20  }
  0x28   : > { %p491_p11 = scmp.ge.s32.totalorder %s812_s11, 1  ;;  %p122_p13 = scmp.lt.s32.totalorder %s812_s11, 5 }
  0x2a   : > { %p123_p3 = pnand %p491_p11, %p122_p13 }
  0x2b   : > { %s128_s21 = sand.u32 (!%p123_p3), 1, %s796_s7  }
  0x2c   : > { %126 = sbr.rel (%p123_p3) target bundleno = 483 (0x1e3), region = 24  ;;  %s492_s22 = sshll.u32 (!%p123_p3), %s128_s21, 7 }
  0x2d   : > { %s129_s23 = scalar_lea.sflag (!%p123_p3), [#allocation3], %s128_s21  ;;  %s930_s25 = scalar_lea.vmem (!%p123_p3), [#allocation2], %s492_s22 }
  0x33   : > { %783 = dma.done.wait (%p876_p7), %s129_s23, 2048  }
  0x34   : > { %785 = vsyncadd (%p876_p7), %s129_s23, 4294965248  ;;  %p493_p4 = scmp.ne.s32.totalorder %s804_s9, 0 }
  0x35   : > { %v817_v0 = vmov (!%p493_p4), 0.0  }
  0x36   : > { %152 = sbr.rel (%p493_p4) target bundleno = 62 (0x3e), region = 32  ;;  %153 = vst [vmem:[#allocation5] sm:$0xff] (!%p493_p4), %v817_v0  ;;  %154 = vst [vmem:[#allocation5 + $0x8] sm:$0xff] (!%p493_p4), %v817_v0 }
  0x37   : > { %155 = vst [vmem:[#allocation5 + $0x10] sm:$0xff] (!%p493_p4), %v817_v0  ;;  %156 = vst [vmem:[#allocation5 + $0x18] sm:$0xff] (!%p493_p4), %v817_v0 }
  0x38   : > { %157 = vst [vmem:[#allocation5 + $0x20] sm:$0xff] (!%p493_p4), %v817_v0  ;;  %158 = vst [vmem:[#allocation5 + $0x28] sm:$0xff] (!%p493_p4), %v817_v0 }
  0x39   : > { %159 = vst [vmem:[#allocation5 + $0x30] sm:$0xff] (!%p493_p4), %v817_v0  ;;  %160 = vst [vmem:[#allocation5 + $0x38] sm:$0xff] (!%p493_p4), %v817_v0 }
  0x3a   : > { %161 = vst [vmem:[#allocation5 + $0x40] sm:$0xff] (!%p493_p4), %v817_v0  ;;  %162 = vst [vmem:[#allocation5 + $0x48] sm:$0xff] (!%p493_p4), %v817_v0 }
  0x3b   : > { %163 = vst [vmem:[#allocation5 + $0x50] sm:$0xff] (!%p493_p4), %v817_v0  ;;  %164 = vst [vmem:[#allocation5 + $0x58] sm:$0xff] (!%p493_p4), %v817_v0 }
  0x3c   : > { %165 = vst [vmem:[#allocation5 + $0x60] sm:$0xff] (!%p493_p4), %v817_v0  ;;  %166 = vst [vmem:[#allocation5 + $0x68] sm:$0xff] (!%p493_p4), %v817_v0 }
  0x3d   : > { %167 = vst [vmem:[#allocation5 + $0x70] sm:$0xff] %v817_v0  ;;  %168 = vst [vmem:[#allocation5 + $0x78] sm:$0xff] %v817_v0 }
  0x3e PF: > { %v169_v1 = vld [vmem:[%s930_s25] sm:$0xff]  ;;  %v170_v2 = vld [vmem:[%s930_s25 + $0x8] sm:$0xff]  ;;  %v171_v4 = vld [vmem:[%s930_s25 + $0x10] sm:$0xff]  ;;  %s818_s9 = smov [#allocation5]   ;;  %p955_p7 = scmp.eq.s32.totalorder %s485_s12, 3 }
  0x3f   : > { %201 = vxpose.xlu0.b32.start [1/16] %v169_v1, 128  ;;  %v587_v3 = vpack.c.bf16 %v170_v2, %v169_v1  ;;  %v172_v5 = vld [vmem:[%s930_s25 + $0x18] sm:$0xff]  ;;  %v173_v7 = vld [vmem:[%s930_s25 + $0x20] sm:$0xff]  ;;  %v174_v8 = vld [vmem:[%s930_s25 + $0x28] sm:$0xff]  ;;  %s419_s17 = sshll.u32 %s818_s9, 4  ;;  %s420_s17 = int_to_ptr.vmem [resolvable:$true] %s419_s17 }
  0x40   : > { %v591_v6 = vpack.c.bf16 %v172_v5, %v171_v4  ;;  %v595_v9 = vpack.c.bf16 %v174_v8, %v173_v7  ;;  %v175_v10 = vld [vmem:[%s930_s25 + $0x30] sm:$0xff]  ;;  %v176_v11 = vld [vmem:[%s930_s25 + $0x38] sm:$0xff]  ;;  %v177_v13 = vld [vmem:[%s930_s25 + $0x40] sm:$0xff]  ;;  %s732_s26 = scalar_lea.vmem %s420_s17, 2048  ;;  %p739_p8 = scmp.lt.s32.totalorder %s420_s17, %s420_s17 }
  0x41   : > { %588 = vmatprep.subr.bf16.mxu0 %v587_v3  ;;  %619 = vmatprep.subr.bf16.mxu1 %v587_v3  ;;  %v599_v12 = vpack.c.bf16 %v176_v11, %v175_v10  ;;  %v178_v14 = vld [vmem:[%s930_s25 + $0x48] sm:$0xff]  ;;  %v179_v16 = vld [vmem:[%s930_s25 + $0x50] sm:$0xff]  ;;  %v180_v17 = vld [vmem:[%s930_s25 + $0x58] sm:$0xff]  ;;  %p733_p9 = scmp.ne.s32.totalorder %s420_s17, %s732_s26  ;;  %p740_p10 = scmp.lt.s32.totalorder %s732_s26, %s732_s26 }
  0x42   : > { %590 = vmatpush3.bf16.msra.mxu0 %v587_v3  ;;  %627 = vmatpush3.bf16.msra.mxu1 %v587_v3  ;;  %v603_v15 = vpack.c.bf16 %v178_v14, %v177_v13  ;;  %v607_v18 = vpack.c.bf16 %v180_v17, %v179_v16  ;;  %v181_v19 = vld [vmem:[%s930_s25 + $0x60] sm:$0xff]  ;;  %v182_v20 = vld [vmem:[%s930_s25 + $0x68] sm:$0xff]  ;;  %v183_v22 = vld [vmem:[%s930_s25 + $0x70] sm:$0xff] }
  0x43   : > { %202 = vxpose.xlu0.b32.cont [2/16] %v170_v2, 128  ;;  %592 = vmatprep.subr.bf16.mxu0 %v591_v6  ;;  %v611_v21 = vpack.c.bf16 %v182_v20, %v181_v19  ;;  %v184_v23 = vld [vmem:[%s930_s25 + $0x78] sm:$0xff]  ;;  %v186_v41 = vld [vmem:[#allocation5 + $0x8] sm:$0xff]  ;;  %v185_v42 = vld [vmem:[#allocation5] sm:$0xff]  ;;  %p734_p5 = pnand %p733_p9, %p955_p7  ;;  %p741_p12 = por %p740_p10, %p739_p8 }
  0x44   : > { %620 = vmatprep.subr.bf16.mxu1 %v591_v6  ;;  %v615_v24 = vpack.c.bf16 %v184_v23, %v183_v22  ;;  %v188_v47 = vld [vmem:[#allocation5 + $0x18] sm:$0xff]  ;;  %v187_v48 = vld [vmem:[#allocation5 + $0x10] sm:$0xff]  ;;  %v190_v53 = vld [vmem:[#allocation5 + $0x28] sm:$0xff] }
  0x45   : > { %v189_v54 = vld [vmem:[#allocation5 + $0x20] sm:$0xff]  ;;  %v192_v59 = vld [vmem:[#allocation5 + $0x38] sm:$0xff]  ;;  %v191_v60 = vld [vmem:[#allocation5 + $0x30] sm:$0xff]  ;;  %p735_p6 = pneg %p734_p5 }
  0x46   : > { %594 = vmatpush3.bf16.msra.mxu0 %v591_v6  ;;  %628 = vmatpush3.bf16.msra.mxu1 %v591_v6  ;;  %v194_v1 = vld [vmem:[#allocation5 + $0x48] sm:$0xff]  ;;  %v193_v2 = vld [vmem:[#allocation5 + $0x40] sm:$0xff] }
  0x47   : > { %203 = vxpose.xlu0.b32.cont [3/16] %v171_v4, 128  ;;  %596 = vmatprep.subr.bf16.mxu0 %v595_v9  ;;  %p742_p0 = pnand %p741_p12, %p735_p6 }
  0x48   : > { %621 = vmatprep.subr.bf16.mxu1 %v595_v9 }
  0x4a   : > { %598 = vmatpush3.bf16.msra.mxu0 %v595_v9  ;;  %629 = vmatpush3.bf16.msra.mxu1 %v595_v9 }
  0x4b   : > { %204 = vxpose.xlu0.b32.cont [4/16] %v172_v5, 128  ;;  %600 = vmatprep.subr.bf16.mxu0 %v599_v12 }
  0x4c   : > { %622 = vmatprep.subr.bf16.mxu1 %v599_v12 }
  0x4e   : > { %602 = vmatpush3.bf16.msra.mxu0 %v599_v12  ;;  %630 = vmatpush3.bf16.msra.mxu1 %v599_v12 }
  0x4f   : > { %205 = vxpose.xlu0.b32.cont [5/16] %v173_v7, 128  ;;  %604 = vmatprep.subr.bf16.mxu0 %v603_v15  ;;  %v196_v7 = vld [vmem:[#allocation5 + $0x58] sm:$0xff] }
  0x50   : > { %623 = vmatprep.subr.bf16.mxu1 %v603_v15 }
  0x52   : > { %606 = vmatpush3.bf16.msra.mxu0 %v603_v15  ;;  %631 = vmatpush3.bf16.msra.mxu1 %v603_v15 }
  0x53   : > { %206 = vxpose.xlu0.b32.cont [6/16] %v174_v8, 128  ;;  %608 = vmatprep.subr.bf16.mxu0 %v607_v18  ;;  %v195_v8 = vld [vmem:[#allocation5 + $0x50] sm:$0xff] }
  0x54   : > { %624 = vmatprep.subr.bf16.mxu1 %v607_v18 }
  0x56   : > { %610 = vmatpush3.bf16.msra.mxu0 %v607_v18  ;;  %632 = vmatpush3.bf16.msra.mxu1 %v607_v18 }
  0x57   : > { %207 = vxpose.xlu0.b32.cont [7/16] %v175_v10, 128  ;;  %612 = vmatprep.subr.bf16.mxu0 %v611_v21 }
  0x58   : > { %625 = vmatprep.subr.bf16.mxu1 %v611_v21 }
  0x5a   : > { %614 = vmatpush3.bf16.msra.mxu0 %v611_v21  ;;  %633 = vmatpush3.bf16.msra.mxu1 %v611_v21 }
  0x5b   : > { %208 = vxpose.xlu0.b32.cont [8/16] %v176_v11, 128  ;;  %616 = vmatprep.subr.bf16.mxu0 %v615_v24 }
  0x5c   : > { %626 = vmatprep.subr.bf16.mxu1 %v615_v24 }
  0x5e   : > { %618 = vmatpush3.bf16.msra.mxu0 %v615_v24  ;;  %634 = vmatpush3.bf16.msra.mxu1 %v615_v24 }
  0x5f   : > { %209 = vxpose.xlu0.b32.cont [9/16] %v177_v13, 128  ;;  %v198_v13 = vld [vmem:[#allocation5 + $0x68] sm:$0xff] }
  0x63   : > { %210 = vxpose.xlu0.b32.cont [10/16] %v178_v14, 128  ;;  %v197_v14 = vld [vmem:[#allocation5 + $0x60] sm:$0xff] }
  0x67   : > { %211 = vxpose.xlu0.b32.cont [11/16] %v179_v16, 128 }
  0x6b   : > { %212 = vxpose.xlu0.b32.cont [12/16] %v180_v17, 128 }
  0x6f   : > { %213 = vxpose.xlu0.b32.cont [13/16] %v181_v19, 128  ;;  %v200_v19 = vld [vmem:[#allocation5 + $0x78] sm:$0xff] }
  0x73   : > { %214 = vxpose.xlu0.b32.cont [14/16] %v182_v20, 128  ;;  %v199_v20 = vld [vmem:[#allocation5 + $0x70] sm:$0xff] }
  0x77   : > { %215 = vxpose.xlu0.b32.cont [15/16] %v183_v22, 128 }
  0x7b   : > { %216 = vxpose.xlu0.b32.end [16/16] %v184_v23, 128 }
  0xbf   : > { %v217_v25 = vpop.trf.xlu0 }
  0xc0   : > { %563 = vmatprep.mubr.f32.mxu0 %v217_v25 }
  0xc3   : > { %v218_v26 = vpop.trf.xlu0 }
  0xc4   : > { %564 = vmatmul.mubr.f32.vlgmr.msra.gmra.mrb[0].mxu0 %v218_v26 }
  0xc7   : > { %v219_v27 = vpop.trf.xlu0 }
  0xc8   : > { %566 = vmatprep.mubr.f32.mxu0 %v219_v27 }
  0xcb   : > { %v220_v28 = vpop.trf.xlu0 }
  0xcc   : > { %567 = vmatmul.mubr.f32.gmra.mrb[2].mxu0 %v220_v28 }
  0xcf   : > { %v221_v29 = vpop.trf.xlu0 }
  0xd0   : > { %569 = vmatprep.mubr.f32.mxu0 %v221_v29 }
  0xd3   : > { %v222_v30 = vpop.trf.xlu0 }
  0xd4   : > { %570 = vmatmul.mubr.f32.gmra.mrb[4].mxu0 %v222_v30 }
  0xd7   : > { %v223_v31 = vpop.trf.xlu0 }
  0xd8   : > { %572 = vmatprep.mubr.f32.mxu0 %v223_v31 }
  0xdb   : > { %v224_v32 = vpop.trf.xlu0 }
  0xdc   : > { %573 = vmatmul.mubr.f32.gmra.mrb[6].mxu0 %v224_v32 }
  0xdf   : > { %v225_v33 = vpop.trf.xlu0 }
  0xe0   : > { %575 = vmatprep.mubr.f32.mxu1 %v225_v33 }
  0xe3   : > { %v226_v34 = vpop.trf.xlu0 }
  0xe4   : > { %576 = vmatmul.mubr.f32.vlgmr.msra.gmra.mrb[0].mxu1 %v226_v34 }
  0xe7   : > { %v227_v35 = vpop.trf.xlu0 }
  0xe8   : > { %578 = vmatprep.mubr.f32.mxu1 %v227_v35 }
  0xeb   : > { %v228_v36 = vpop.trf.xlu0 }
  0xec   : > { %579 = vmatmul.mubr.f32.gmra.mrb[2].mxu1 %v228_v36 }
  0xef   : > { %v229_v37 = vpop.trf.xlu0 }
  0xf0   : > { %581 = vmatprep.mubr.f32.mxu1 %v229_v37 }
  0xf3   : > { %v230_v38 = vpop.trf.xlu0 }
  0xf4   : > { %582 = vmatmul.mubr.f32.gmra.mrb[4].mxu1 %v230_v38 }
  0xf7   : > { %v231_v39 = vpop.trf.xlu0 }
  0xf8   : > { %584 = vmatprep.mubr.f32.mxu1 %v231_v39 }
  0xfb   : > { %v232_v40 = vpop.trf.xlu0 }
  0xfc   : > { %585 = vmatmul.mubr.f32.gmra.mrb[6].mxu1 %v232_v40 }
 0x197   : > { %v565_v43 = vpop.f32.mrb[0].mxu0 }
 0x198   : > { %v379_v44 = vadd.f32 %v565_v43, %v186_v41  ;;  %v299_v45 = vpop.f32.mrb[1].mxu0 }
 0x199   : > { %v378_v46 = vadd.f32 %v299_v45, %v185_v42 }
 0x19a   : > { %395 = vst [vmem:[#allocation5 + $0x8] sm:$0xff] %v379_v44 }
 0x19b   : > { %394 = vst [vmem:[#allocation5] sm:$0xff] %v378_v46 }
 0x19f   : > { %v568_v49 = vpop.f32.mrb[2].mxu0 }
 0x1a0   : > { %v381_v50 = vadd.f32 %v568_v49, %v188_v47  ;;  %v309_v51 = vpop.f32.mrb[3].mxu0 }
 0x1a1   : > { %v380_v52 = vadd.f32 %v309_v51, %v187_v48 }
 0x1a2   : > { %397 = vst [vmem:[#allocation5 + $0x18] sm:$0xff] %v381_v50 }
 0x1a3   : > { %396 = vst [vmem:[#allocation5 + $0x10] sm:$0xff] %v380_v52 }
 0x1a7   : > { %v571_v55 = vpop.f32.mrb[4].mxu0 }
 0x1a8   : > { %v383_v56 = vadd.f32 %v571_v55, %v190_v53  ;;  %v319_v57 = vpop.f32.mrb[5].mxu0 }
 0x1a9   : > { %v382_v58 = vadd.f32 %v319_v57, %v189_v54 }
 0x1aa   : > { %399 = vst [vmem:[#allocation5 + $0x28] sm:$0xff] %v383_v56 }
 0x1ab   : > { %398 = vst [vmem:[#allocation5 + $0x20] sm:$0xff] %v382_v58 }
 0x1af   : > { %v574_v61 = vpop.f32.mrb[6].mxu0 }
 0x1b0   : > { %v385_v62 = vadd.f32 %v574_v61, %v192_v59  ;;  %v329_v63 = vpop.f32.mrb[7].mxu0 }
 0x1b1   : > { %v384_v0 = vadd.f32 %v329_v63, %v191_v60 }
 0x1b2   : > { %401 = vst [vmem:[#allocation5 + $0x38] sm:$0xff] %v385_v62 }
 0x1b3   : > { %400 = vst [vmem:[#allocation5 + $0x30] sm:$0xff] %v384_v0 }
 0x1b7   : > { %v577_v3 = vpop.f32.mrb[0].mxu1 }
 0x1b8   : > { %v387_v4 = vadd.f32 %v577_v3, %v194_v1  ;;  %v339_v5 = vpop.f32.mrb[1].mxu1 }
 0x1b9   : > { %v386_v6 = vadd.f32 %v339_v5, %v193_v2 }
 0x1ba   : > { %403 = vst [vmem:[#allocation5 + $0x48] sm:$0xff] %v387_v4 }
 0x1bb   : > { %402 = vst [vmem:[#allocation5 + $0x40] sm:$0xff] %v386_v6 }
 0x1bf   : > { %v580_v9 = vpop.f32.mrb[2].mxu1 }
 0x1c0   : > { %v389_v10 = vadd.f32 %v580_v9, %v196_v7  ;;  %v349_v11 = vpop.f32.mrb[3].mxu1 }
 0x1c1   : > { %v388_v12 = vadd.f32 %v349_v11, %v195_v8 }
 0x1c2   : > { %405 = vst [vmem:[#allocation5 + $0x58] sm:$0xff] %v389_v10 }
 0x1c3   : > { %404 = vst [vmem:[#allocation5 + $0x50] sm:$0xff] %v388_v12 }
 0x1c7   : > { %v583_v15 = vpop.f32.mrb[4].mxu1 }
 0x1c8   : > { %v391_v16 = vadd.f32 %v583_v15, %v198_v13  ;;  %v359_v17 = vpop.f32.mrb[5].mxu1 }
 0x1c9   : > { %v390_v18 = vadd.f32 %v359_v17, %v197_v14 }
 0x1ca   : > { %407 = vst [vmem:[#allocation5 + $0x68] sm:$0xff] %v391_v16 }
 0x1cb   : > { %406 = vst [vmem:[#allocation5 + $0x60] sm:$0xff] %v390_v18 }
 0x1cf   : > { %v586_v21 = vpop.f32.mrb[6].mxu1 }
 0x1d0   : > { %v393_v22 = vadd.f32 %v586_v21, %v200_v19  ;;  %v369_v23 = vpop.f32.mrb[7].mxu1 }
 0x1d1   : > { %v392_v24 = vadd.f32 %v369_v23, %v199_v20 }
 0x1d2   : > { %409 = vst [vmem:[#allocation5 + $0x78] sm:$0xff] %v393_v22 }
 0x1d3   : > { %408 = vst [vmem:[#allocation5 + $0x70] sm:$0xff] %v392_v24 }
 0x1d4   : > { %745 = shalt.err (!%p742_p0)
}
 0x1d5   : > { %s746_s28 = scalar_lea.hbm %s1000_s1, 2048 }
 0x1d6   : > { %p747_p1 = scmp.ne.s32.totalorder %s1000_s1, %s746_s28  ;;  %p752_p13 = scmp.lt.u32.totalorder %s746_s28, %s1000_s1 }
 0x1d8   : > { %p748_p2 = pnand %p747_p1, %p955_p7 }
 0x1da   : > { %p749_p11 = pneg %p748_p2 }
 0x1dc   : > { %p754_p3 = pnand %p752_p13, %p749_p11 }
 0x1de   : > { %757 = shalt.err (!%p754_p3)
}
 0x1df   : > { %s819_s4 = smov 128   ;;  %s820_s5 = smov 8  }
 0x1e0   : > { %638 = dma.vmem_to_hbm [thread:$0]  (%p955_p7), %s420_s17, 2048, %s1000_s1, [#allocation4], %s819_s4, %s819_s4, %s820_s5  }
 0x1e1   : > { %787 = dma.done.wait (%p955_p7), [#allocation4], 2048  }
 0x1e2   : > { %789 = vsyncadd (%p955_p7), [#allocation4], 4294965248 }
 0x1e3 PF: > { %s15_s11 = sadd.s32 1, %s812_s11   ;;  %s1005_s6 = smov %s796_s7 }
 0x1e4   : > { %p12_p4 = scmp.ge.s32.totalorder %s15_s11, 6   ;;  %s1006_s7 = smov %s800_s8 }
 0x1e5   : > { %s1007_s8 = smov %s882_s18  ;;  %s1008_s9 = smov %s808_s10 }
 0x1e6   : > { %s1009_s10 = smov %s1011_s13  ;;  %14 = sbr.rel (!%p12_p4) target bundleno = 5 (0x5), region = 66 }
 0x1ed   :  { %435 = vsyncpa [#allocation3], 1 }
 0x1ee   :  { %437 = vsyncpa [#allocation3 + $0x1], 1 }
 0x1ef   :  { %438 = vsyncpa [#allocation4], 1 }
 0x1f0   :  { %440 = vsyncpa [#allocation4 + $0x1], 1 }

</bundles_post_ra>
